<compile_context>
chip_gen: v7x
topology: tpu7x:2x2x1
jax: 0.10.0
libtpu: 0.0.40
codegen_flags: <defaults>
</compile_context>

<pallas_src>
import jax
import jax.numpy as jnp
from jax.experimental import pallas as pl
from jax.experimental.pallas import tpu as pltpu

LANE = 128


def _vmem_limit_bytes():
    """Scoped-VMEM limit with headroom below physical (64 MiB v7x, 128 MiB v5e/v6e)."""
    try:
        cap = getattr(pltpu.get_tpu_info(), "vmem_capacity_bytes", 64 << 20)
    except Exception:
        cap = 64 << 20
    return int(min(cap - (8 << 20), 100 << 20))


# ----------------------------------------------------------------------------
# Kernels
# ----------------------------------------------------------------------------
def graph_conv_kernel(adj_ref, xall_ref, xi_ref, wr_ref, ws_ref, b_ref, h_ref):
    """One GraphConv layer + ReLU for one node tile.

    grid = (n_tiles,), axis "parallel".
      adj_ref  : (TM, Np) int8   adjacency row band (dst rows, all src cols)
      xall_ref : (Np, C)  bf16   all node features (resident, constant index_map)
      xi_ref   : (TM, C)  bf16   self (root) features of this node tile
      wr_ref   : (C, H)   bf16   lin_rel weight (resident)
      ws_ref   : (C, H)   bf16   lin_root weight (resident)
      b_ref    : (1, H)   f32    lin_rel bias (resident)
      h_ref    : (TM, H)  bf16   output activations
    """
    # int8 -> bf16 widening on the VPU (slack slot); adjacency bytes halved in HBM.
    adj = adj_ref[...].astype(jnp.float32).astype(jnp.bfloat16)
    agg = jnp.dot(adj, xall_ref[...], preferred_element_type=jnp.float32)
    h = jnp.dot(agg.astype(jnp.bfloat16), wr_ref[...],
                preferred_element_type=jnp.float32)
    h = h + jnp.dot(xi_ref[...], ws_ref[...],
                    preferred_element_type=jnp.float32)
    h = h + b_ref[...]
    h_ref[...] = jnp.maximum(h, 0.0).astype(h_ref.dtype)


def graph_conv_pool_kernel(adj_ref, hall_ref, hi_ref, wr_ref, ws_ref, b_ref,
                           pool_ref, part_ref):
    """GraphConv layer 2 + ReLU + per-tile sum-pool partials.

    grid = (n_tiles,), axis "parallel".
      adj_ref  : (TM, Np) int8
      hall_ref : (Np, H)  bf16   all layer-1 activations (resident)
      hi_ref   : (TM, H)  bf16   self activations of this node tile
      wr_ref   : (H, H)   bf16   (resident)
      ws_ref   : (H, H)   bf16   (resident)
      b_ref    : (1, H)   f32    (resident)
      pool_ref : (G, TM)  bf16   0/1 graph-membership indicator for this tile
      part_ref : (G, H)   f32    per-tile pooled partial sums (one block per tile)
    """
    adj = adj_ref[...].astype(jnp.float32).astype(jnp.bfloat16)
    agg = jnp.dot(adj, hall_ref[...], preferred_element_type=jnp.float32)
    h = jnp.dot(agg.astype(jnp.bfloat16), wr_ref[...],
                preferred_element_type=jnp.float32)
    h = h + jnp.dot(hi_ref[...], ws_ref[...],
                    preferred_element_type=jnp.float32)
    h = h + b_ref[...]
    h2 = jnp.maximum(h, 0.0).astype(jnp.bfloat16)
    # Unnormalized sum pool (exact 0/1 weights); mean scale applied in f32 outside.
    part_ref[...] = jnp.dot(pool_ref[...], h2, preferred_element_type=jnp.float32)


# ----------------------------------------------------------------------------
# pallas_call wrappers
# ----------------------------------------------------------------------------
def _graph_conv(adj_i8, x_all, w_rel, w_root, b, tile_m):
    n_pad = adj_i8.shape[0]
    c = x_all.shape[1]
    h = w_rel.shape[1]
    n_tiles = n_pad // tile_m

    flops = 2 * n_pad * n_pad * c + 4 * n_pad * c * h
    bytes_accessed = (adj_i8.size + 2 * x_all.size * 2
                      + 2 * c * h * 2 + h * 4 + n_pad * h * 2)

    return pl.pallas_call(
        graph_conv_kernel,
        out_shape=jax.ShapeDtypeStruct((n_pad, h), jnp.bfloat16),
        grid_spec=pltpu.PrefetchScalarGridSpec(
            num_scalar_prefetch=0,
            grid=(n_tiles,),
            in_specs=[
                pl.BlockSpec((tile_m, n_pad), lambda i: (i, 0)),  # adj row band
                pl.BlockSpec((n_pad, c), lambda i: (0, 0)),       # x (resident)
                pl.BlockSpec((tile_m, c), lambda i: (i, 0)),      # x self tile
                pl.BlockSpec((c, h), lambda i: (0, 0)),           # W_rel (resident)
                pl.BlockSpec((c, h), lambda i: (0, 0)),           # W_root (resident)
                pl.BlockSpec((1, h), lambda i: (0, 0)),           # bias (resident)
            ],
            out_specs=pl.BlockSpec((tile_m, h), lambda i: (i, 0)),
        ),
        compiler_params=pltpu.CompilerParams(
            dimension_semantics=("parallel",),
            vmem_limit_bytes=_vmem_limit_bytes()),
        cost_estimate=pl.CostEstimate(flops=flops, transcendentals=0,
                                      bytes_accessed=bytes_accessed),
    )(adj_i8, x_all, x_all, w_rel, w_root, b)


def _graph_conv_pool(adj_i8, h_all, w_rel, w_root, b, pool, tile_m):
    n_pad = adj_i8.shape[0]
    h = w_rel.shape[1]
    g = pool.shape[0]
    n_tiles = n_pad // tile_m

    flops = 2 * n_pad * n_pad * h + 4 * n_pad * h * h + 2 * g * n_pad * h
    bytes_accessed = (adj_i8.size + 2 * h_all.size * 2 + 2 * h * h * 2
                      + h * 4 + pool.size * 2 + n_tiles * g * h * 4)

    partials = pl.pallas_call(
        graph_conv_pool_kernel,
        out_shape=jax.ShapeDtypeStruct((n_tiles * g, h), jnp.float32),
        grid_spec=pltpu.PrefetchScalarGridSpec(
            num_scalar_prefetch=0,
            grid=(n_tiles,),
            in_specs=[
                pl.BlockSpec((tile_m, n_pad), lambda i: (i, 0)),  # adj row band
                pl.BlockSpec((n_pad, h), lambda i: (0, 0)),       # h1 (resident)
                pl.BlockSpec((tile_m, h), lambda i: (i, 0)),      # h1 self tile
                pl.BlockSpec((h, h), lambda i: (0, 0)),           # W_rel (resident)
                pl.BlockSpec((h, h), lambda i: (0, 0)),           # W_root (resident)
                pl.BlockSpec((1, h), lambda i: (0, 0)),           # bias (resident)
                pl.BlockSpec((g, tile_m), lambda i: (0, i)),      # pool indicator
            ],
            out_specs=pl.BlockSpec((g, h), lambda i: (i, 0)),
        ),
        compiler_params=pltpu.CompilerParams(
            dimension_semantics=("parallel",),
            vmem_limit_bytes=_vmem_limit_bytes()),
        cost_estimate=pl.CostEstimate(flops=flops, transcendentals=0,
                                      bytes_accessed=bytes_accessed),
    )(adj_i8, h_all, h_all, w_rel, w_root, b, pool)
    return partials.reshape(n_tiles, g, h)


# ----------------------------------------------------------------------------
# Forward pass glue
# ----------------------------------------------------------------------------
def _pad2(a, rows, cols):
    return jnp.pad(a, ((0, rows - a.shape[0]), (0, cols - a.shape[1])))


def graph_classifier_forward(x, edge_index, batch, num_graphs, params,
                             *, tile_m=256):
    # tile_m=256 fills the 256x256 MXU on v6e/v7x; use tile_m=128 on v5e.
    (w1r, w1s, b1, w2r, w2s, b2, w3, b3) = params
    n, c_in = x.shape
    hid = w1r.shape[1]

    n_pad = tile_m * pl.cdiv(n, tile_m)
    c_pad = LANE * pl.cdiv(c_in, LANE)
    h_pad = LANE * pl.cdiv(hid, LANE)
    g_pad = 16 * pl.cdiv(num_graphs, 16)     # bf16 packs 16 rows per vreg

    # Dense int8 adjacency: adj[dst, src] = #edges src->dst (sum aggregation).
    # Exact for edge multiplicity <= 127.  Built once here; in a training loop
    # it would be precomputed & cached.
    src, dst = edge_index[0], edge_index[1]
    adj_i8 = (jnp.zeros((n_pad, n_pad), jnp.int32)
              .at[dst, src].add(1).astype(jnp.int8))

    # 0/1 graph-membership indicator (exact in bf16); padded nodes -> graph -1.
    batch_p = jnp.pad(batch, (0, n_pad - n), constant_values=-1)
    onehot = (batch_p[None, :] == jnp.arange(g_pad)[:, None]).astype(jnp.bfloat16)
    counts = jnp.zeros((g_pad,), jnp.float32).at[batch].add(1.0)
    inv_counts = 1.0 / jnp.maximum(counts, 1.0)

    x_p = _pad2(x, n_pad, c_pad).astype(jnp.bfloat16)
    w1r_p = _pad2(w1r, c_pad, h_pad).astype(jnp.bfloat16)
    w1s_p = _pad2(w1s, c_pad, h_pad).astype(jnp.bfloat16)
    w2r_p = _pad2(w2r, h_pad, h_pad).astype(jnp.bfloat16)
    w2s_p = _pad2(w2s, h_pad, h_pad).astype(jnp.bfloat16)
    b1_p = _pad2(b1, 1, h_pad)
    b2_p = _pad2(b2, 1, h_pad)

    # conv1 + relu
    h1 = _graph_conv(adj_i8, x_p, w1r_p, w1s_p, b1_p, tile_m)
    # conv2 + relu + per-tile sum pool (h2 never written to HBM)
    partials = _graph_conv_pool(adj_i8, h1, w2r_p, w2s_p, b2_p, onehot, tile_m)

    # Mean scale in f32 + tiny final Linear in plain XLA.
    pooled = partials.sum(axis=0) * inv_counts[:, None]            # (g_pad, h_pad) f32
    logits = (jnp.dot(pooled[:num_graphs, :hid].astype(jnp.bfloat16),
                      w3.astype(jnp.bfloat16),
                      preferred_element_type=jnp.float32) + b3)
    return logits


# ----------------------------------------------------------------------------
# Pure-JAX reference (mirrors the kernel's bf16-input / f32-accumulate scheme)
# ----------------------------------------------------------------------------
def reference_forward(x, edge_index, batch, num_graphs, params):
    (w1r, w1s, b1, w2r, w2s, b2, w3, b3) = params
    n = x.shape[0]
    src, dst = edge_index[0], edge_index[1]
    adj = jnp.zeros((n, n), jnp.float32).at[dst, src].add(1.0).astype(jnp.bfloat16)

    def conv(x_b, wr, ws, b):
        agg = jnp.dot(adj, x_b, preferred_element_type=jnp.float32).astype(jnp.bfloat16)
        h = (jnp.dot(agg, wr.astype(jnp.bfloat16), preferred_element_type=jnp.float32)
             + jnp.dot(x_b, ws.astype(jnp.bfloat16), preferred_element_type=jnp.float32)
             + b)
        return jnp.maximum(h, 0.0).astype(jnp.bfloat16)

    h1 = conv(x.astype(jnp.bfloat16), w1r, w1s, b1)
    h2 = conv(h1, w2r, w2s, b2)
    onehot = (batch[None, :] == jnp.arange(num_graphs)[:, None]).astype(jnp.bfloat16)
    counts = jnp.zeros((num_graphs,), jnp.float32).at[batch].add(1.0)
    pooled = (jnp.dot(onehot, h2, preferred_element_type=jnp.float32)
              / jnp.maximum(counts, 1.0)[:, None])
    return jnp.dot(pooled.astype(jnp.bfloat16), w3.astype(jnp.bfloat16),
                   preferred_element_type=jnp.float32) + b3


def init_params(key, in_channels, hidden_channels, num_classes):
    ks = jax.random.split(key, 8)
    scale = 0.1
    # GraphConv: lin_rel (with bias) on aggregated neighbors, lin_root (no bias)
    # on self features.  Weights stored pre-transposed as [in, out].
    w1r = scale * jax.random.normal(ks[0], (in_channels, hidden_channels), jnp.float32)
    w1s = scale * jax.random.normal(ks[1], (in_channels, hidden_channels), jnp.float32)
    b1 = scale * jax.random.normal(ks[2], (1, hidden_channels), jnp.float32)
    w2r = scale * jax.random.normal(ks[3], (hidden_channels, hidden_channels), jnp.float32)
    w2s = scale * jax.random.normal(ks[4], (hidden_channels, hidden_channels), jnp.float32)
    b2 = scale * jax.random.normal(ks[5], (1, hidden_channels), jnp.float32)
    w3 = scale * jax.random.normal(ks[6], (hidden_channels, num_classes), jnp.float32)
    b3 = scale * jax.random.normal(ks[7], (1, num_classes), jnp.float32)
    return (w1r, w1s, b1, w2r, w2s, b2, w3, b3)


if __name__ == "__main__":
    in_channels = 8
    hidden_channels = 32
    num_classes = 8
    nodes_per_graph = 96
    num_graphs = 2
    num_nodes = nodes_per_graph * num_graphs  # 192 -> padded to 256 (one 256-row tile)

    key = jax.random.PRNGKey(0)
    k_x, k_p = jax.random.split(key)

    # Node features [N, C]
    x = jax.random.normal(k_x, (num_nodes, in_channels), jnp.float32)

    # Two graphs; each is a bidirectional ring.
    batch = jnp.repeat(jnp.arange(num_graphs, dtype=jnp.int32), nodes_per_graph)
    edges = []
    for g in range(num_graphs):
        base = g * nodes_per_graph
        for i in range(nodes_per_graph):
            a, b = base + i, base + (i + 1) % nodes_per_graph
            edges.append((a, b))
            edges.append((b, a))
    edge_index = jnp.array(edges, dtype=jnp.int32).T  # [2, E]

    params = init_params(k_p, in_channels, hidden_channels, num_classes)

    out = graph_classifier_forward(x, edge_index, batch, num_graphs, params)
    out = jax.block_until_ready(out)

    ref = reference_forward(x, edge_index, batch, num_graphs, params)
    assert out.shape == (num_graphs, num_classes)
    assert jnp.allclose(out, ref, atol=1e-2, rtol=1e-2), (out, ref)

    print("KERNEL_OK")
</pallas_src>

<mosaic_0001>
module attributes {stable_mosaic.version = 11 : i64} {
  func.func @graph_conv_kernel(%arg0: i32, %arg1: memref<256x256xi8, #tpu.memory_space<vmem>>, %arg2: memref<256x128xbf16, #tpu.memory_space<vmem>>, %arg3: memref<256x128xbf16, #tpu.memory_space<vmem>>, %arg4: memref<128x128xbf16, #tpu.memory_space<vmem>>, %arg5: memref<128x128xbf16, #tpu.memory_space<vmem>>, %arg6: memref<1x128xf32, #tpu.memory_space<vmem>>, %arg7: memref<256x128xbf16, #tpu.memory_space<vmem>>) attributes {dimension_semantics = [#tpu.dimension_semantics<parallel>], iteration_bounds = array<i64: 1>, scalar_prefetch = 0 : i64, scratch_operands = 0 : i64, tpu.core_type = #tpu.core_type<tc>, window_params = [{transform_indices = @transform_0, window_bounds = array<i64: 256, 256>}, {pipeline_mode = #tpu.pipeline_mode<synchronous>, transform_indices = @transform_1, window_bounds = array<i64: 256, 128>}, {transform_indices = @transform_2, window_bounds = array<i64: 256, 128>}, {pipeline_mode = #tpu.pipeline_mode<synchronous>, transform_indices = @transform_3, window_bounds = array<i64: 128, 128>}, {pipeline_mode = #tpu.pipeline_mode<synchronous>, transform_indices = @transform_4, window_bounds = array<i64: 128, 128>}, {pipeline_mode = #tpu.pipeline_mode<synchronous>, transform_indices = @transform_5, window_bounds = array<i64: 1, 128>}, {transform_indices = @transform_6, window_bounds = array<i64: 256, 128>}]} {
    %c0 = arith.constant 0 : index
    %c0_0 = arith.constant 0 : index
    %0 = vector.load %arg1[%c0, %c0_0] : memref<256x256xi8, #tpu.memory_space<vmem>>, vector<256x256xi8>
    %1 = arith.sitofp %0 : vector<256x256xi8> to vector<256x256xf32>
    %2 = arith.truncf %1 : vector<256x256xf32> to vector<256x256xbf16>
    %c0_1 = arith.constant 0 : index
    %c0_2 = arith.constant 0 : index
    %3 = vector.load %arg2[%c0_1, %c0_2] : memref<256x128xbf16, #tpu.memory_space<vmem>>, vector<256x128xbf16>
    %cst = arith.constant dense<0.000000e+00> : vector<256x128xf32>
    %4 = tpu.matmul %2, %3, %cst {dimension_numbers = #tpu.dot_dimension_numbers<[1], [0], [0], [1], [0, 0, 1, 1], [], []>} : vector<256x256xbf16>, vector<256x128xbf16>, vector<256x128xf32> -> vector<256x128xf32>
    %5 = arith.truncf %4 : vector<256x128xf32> to vector<256x128xbf16>
    %c0_3 = arith.constant 0 : index
    %c0_4 = arith.constant 0 : index
    %6 = vector.load %arg4[%c0_3, %c0_4] : memref<128x128xbf16, #tpu.memory_space<vmem>>, vector<128x128xbf16>
    %cst_5 = arith.constant dense<0.000000e+00> : vector<256x128xf32>
    %7 = tpu.matmul %5, %6, %cst_5 {dimension_numbers = #tpu.dot_dimension_numbers<[1], [0], [0], [1], [0, 0, 1, 1], [], []>} : vector<256x128xbf16>, vector<128x128xbf16>, vector<256x128xf32> -> vector<256x128xf32>
    %c0_6 = arith.constant 0 : index
    %c0_7 = arith.constant 0 : index
    %8 = vector.load %arg3[%c0_6, %c0_7] : memref<256x128xbf16, #tpu.memory_space<vmem>>, vector<256x128xbf16>
    %c0_8 = arith.constant 0 : index
    %c0_9 = arith.constant 0 : index
    %9 = vector.load %arg5[%c0_8, %c0_9] : memref<128x128xbf16, #tpu.memory_space<vmem>>, vector<128x128xbf16>
    %cst_10 = arith.constant dense<0.000000e+00> : vector<256x128xf32>
    %10 = tpu.matmul %8, %9, %cst_10 {dimension_numbers = #tpu.dot_dimension_numbers<[1], [0], [0], [1], [0, 0, 1, 1], [], []>} : vector<256x128xbf16>, vector<128x128xbf16>, vector<256x128xf32> -> vector<256x128xf32>
    %11 = arith.addf %7, %10 : vector<256x128xf32>
    %c0_11 = arith.constant 0 : index
    %c0_12 = arith.constant 0 : index
    %12 = vector.load %arg6[%c0_11, %c0_12] : memref<1x128xf32, #tpu.memory_space<vmem>>, vector<1x128xf32>
    %13 = vector.broadcast %12 : vector<1x128xf32> to vector<256x128xf32>
    %14 = arith.addf %11, %13 : vector<256x128xf32>
    %cst_13 = arith.constant 0.000000e+00 : f32
    %15 = vector.broadcast %cst_13 : f32 to vector<256x128xf32>
    %16 = arith.maximumf %14, %15 : vector<256x128xf32>
    %17 = arith.truncf %16 : vector<256x128xf32> to vector<256x128xbf16>
    %c0_14 = arith.constant 0 : index
    %c0_15 = arith.constant 0 : index
    %18 = vector.load %arg7[%c0_14, %c0_15] : memref<256x128xbf16, #tpu.memory_space<vmem>>, vector<256x128xbf16>
    tpu.vector_store %arg7[%c0_14, %c0_15], %17 {strides = array<i32>} : memref<256x128xbf16, #tpu.memory_space<vmem>>, vector<256x128xbf16>,
    return
  }
  func.func @transform_0(%arg0: i32) -> (i32, i32) {
    %c0_i32 = arith.constant 0 : i32
    %c0_i32_0 = arith.constant 0 : i32
    return %arg0, %c0_i32 : i32, i32
  }
  func.func @transform_1(%arg0: i32) -> (i32, i32) {
    %c0_i32 = arith.constant 0 : i32
    %c0_i32_0 = arith.constant 0 : i32
    %c0_i32_1 = arith.constant 0 : i32
    return %c0_i32, %c0_i32_0 : i32, i32
  }
  func.func @transform_2(%arg0: i32) -> (i32, i32) {
    %c0_i32 = arith.constant 0 : i32
    %c0_i32_0 = arith.constant 0 : i32
    return %arg0, %c0_i32 : i32, i32
  }
  func.func @transform_3(%arg0: i32) -> (i32, i32) {
    %c0_i32 = arith.constant 0 : i32
    %c0_i32_0 = arith.constant 0 : i32
    %c0_i32_1 = arith.constant 0 : i32
    return %c0_i32, %c0_i32_0 : i32, i32
  }
  func.func @transform_4(%arg0: i32) -> (i32, i32) {
    %c0_i32 = arith.constant 0 : i32
    %c0_i32_0 = arith.constant 0 : i32
    %c0_i32_1 = arith.constant 0 : i32
    return %c0_i32, %c0_i32_0 : i32, i32
  }
  func.func @transform_5(%arg0: i32) -> (i32, i32) {
    %c0_i32 = arith.constant 0 : i32
    %c0_i32_0 = arith.constant 0 : i32
    %c0_i32_1 = arith.constant 0 : i32
    return %c0_i32, %c0_i32_0 : i32, i32
  }
  func.func @transform_6(%arg0: i32) -> (i32, i32) {
    %c0_i32 = arith.constant 0 : i32
    %c0_i32_0 = arith.constant 0 : i32
    return %arg0, %c0_i32 : i32, i32
  }
}

</mosaic_0001>

<bundles_post_ra>
// kernel: tpu_custom_call.1
= control target key start
LH: loop header
LB: loop body
LE: loop exit
PB: predicated region body
PF: predicated region fallthrough
CT: control target
= control target key end

     0   :  { %11 = vsyncpa [#allocation3], 0  ;;  %s2137_s0 = inlined_call_operand.hbm [shape: s8[256,256], index: 0, kind: input, shape index: {}]   ;;  %s2138_s1 = inlined_call_operand.hbm [shape: bf16[256,128], index: 1, kind: input, shape index: {}]   ;;  %s2139_s2 = inlined_call_operand.hbm [shape: bf16[256,128], index: 2, kind: input, shape index: {}]   ;;  %s2140_s3 = inlined_call_operand.hbm [shape: bf16[128,128], index: 3, kind: input, shape index: {}]   ;;  %s2141_s4 = inlined_call_operand.hbm [shape: bf16[128,128], index: 4, kind: input, shape index: {}]   ;;  %s2142_s5 = inlined_call_operand.vmem [shape: f32[1,128], index: 5, kind: input, shape index: {}]   ;;  %s2143_s6 = inlined_call_operand.hbm [shape: bf16[256,128], index: 6, kind: output, shape index: {}]  }
   0x1   :  { %12 = vsyncpa [#allocation6], 0 }
   0x2   :  { %13 = vsyncpa [#allocation9], 0 }
   0x3   :  { %14 = vsyncpa [#allocation4], 0  ;;  %s1968_s21 = smov [#allocation5]   ;;  %s1828_s25 = scalar_lea.hbm %s2138_s1, 2048 }
   0x4   :  { %s32_s22 = sshll.u32 %s1968_s21, 4  ;;  %p1829_p0 = scmp.ne.s32.totalorder %s2138_s1, %s1828_s25  ;;  %s33_s22 = int_to_ptr.vmem [resolvable:$true] %s32_s22 }
   0x5   :  { %p1832_p1 = scmp.lt.u32.totalorder %s1828_s25, %s2138_s1 }
   0x7   :  { %p1834_p2 = pnand %p1832_p1, %p1829_p0 }
   0x9   :  { %1837 = shalt.err (!%p1834_p2)
}
   0xa   :  { %s1838_s30 = scalar_lea.vmem %s33_s22, 2048  ;;  %p1843_p4 = scmp.lt.s32.totalorder %s33_s22, %s33_s22 }
   0xb   :  { %p1839_p3 = scmp.ne.s32.totalorder %s33_s22, %s1838_s30  ;;  %p1844_p5 = scmp.lt.s32.totalorder %s1838_s30, %s1838_s30 }
   0xd   :  { %p1845_p6 = por %p1844_p5, %p1843_p4 }
   0xf   :  { %p1846_p7 = pnand %p1845_p6, %p1839_p3 }
  0x11   :  { %1849 = shalt.err (!%p1846_p7)
}
  0x12   :  { %s1969_s7 = smov 64   ;;  %s1970_s8 = smov 4  }
  0x13   :  { %38 = dma.hbm_to_vmem [thread:$0]  %s2138_s1, 2048, %s33_s22, [#allocation6], %s1969_s7, %s1969_s7, %s1970_s8  }
  0x14   :  { %s1971_s11 = smov [#allocation8]   ;;  %s1972_s13 = smov [#allocation2]  }
  0x15   :  { %s56_s12 = sshll.u32 %s1971_s11, 4  ;;  %s20_s14 = sshll.u32 %s1972_s13, 4  ;;  %s57_s12 = int_to_ptr.vmem [resolvable:$true] %s56_s12  ;;  %s21_s14 = int_to_ptr.vmem [resolvable:$true] %s20_s14 }
  0x16   :  { %s1850_s17 = scalar_lea.hbm %s2140_s3, 1024 }
  0x17   :  { %p1851_p8 = scmp.ne.s32.totalorder %s2140_s3, %s1850_s17  ;;  %p1854_p9 = scmp.lt.u32.totalorder %s1850_s17, %s2140_s3 }
  0x19   :  { %p1856_p10 = pnand %p1854_p9, %p1851_p8 }
  0x1b   :  { %1859 = shalt.err (!%p1856_p10)
}
  0x1c   :  { %s1860_s1 = scalar_lea.vmem %s57_s12, 1024  ;;  %p1865_p12 = scmp.lt.s32.totalorder %s57_s12, %s57_s12 }
  0x1d   :  { %p1861_p11 = scmp.ne.s32.totalorder %s57_s12, %s1860_s1  ;;  %p1866_p13 = scmp.lt.s32.totalorder %s1860_s1, %s1860_s1 }
  0x1f   :  { %p1867_p0 = por %p1866_p13, %p1865_p12 }
  0x21   :  { %p1868_p1 = pnand %p1867_p0, %p1861_p11 }
  0x23   :  { %1871 = shalt.err (!%p1868_p1)
}
  0x24   :  { %62 = dma.hbm_to_vmem [thread:$0]  %s2140_s3, 1024, %s57_s12, [#allocation9], %s1969_s7, %s1969_s7, %s1970_s8  }
  0x25   :  { %s1872_s26 = scalar_lea.hbm %s2137_s0, 2048 }
  0x26   :  { %p1873_p2 = scmp.ne.s32.totalorder %s2137_s0, %s1872_s26  ;;  %p1876_p3 = scmp.lt.u32.totalorder %s1872_s26, %s2137_s0 }
  0x28   :  { %p1878_p4 = pnand %p1876_p3, %p1873_p2 }
  0x2a   :  { %1881 = shalt.err (!%p1878_p4)
}
  0x2b   :  { %s1882_s9 = scalar_lea.vmem %s21_s14, 2048  ;;  %p1887_p6 = scmp.lt.s32.totalorder %s21_s14, %s21_s14 }
  0x2c   :  { %p1883_p5 = scmp.ne.s32.totalorder %s21_s14, %s1882_s9  ;;  %p1888_p7 = scmp.lt.s32.totalorder %s1882_s9, %s1882_s9 }
  0x2e   :  { %p1889_p8 = por %p1888_p7, %p1887_p6 }
  0x30   :  { %p1890_p9 = pnand %p1889_p8, %p1883_p5 }
  0x32   :  { %1893 = shalt.err (!%p1890_p9)
}
  0x33   :  { %s1973_s3 = smov 256   ;;  %s1974_s10 = smov 16  }
  0x34   :  { %26 = dma.hbm_to_vmem [thread:$0]  %s2137_s0, 2048, %s21_s14, [#allocation3], %s1973_s3, %s1973_s3, %s1974_s10  }
  0x35   :  { %s1975_s13 = smov [#allocation7]   ;;  %s1976_s16 = smov [#allocation10]  }
  0x36   :  { %s44_s15 = sshll.u32 %s1975_s13, 4  ;;  %s68_s17 = sshll.u32 %s1976_s16, 4  ;;  %s45_s15 = int_to_ptr.vmem [resolvable:$true] %s44_s15  ;;  %s69_s17 = int_to_ptr.vmem [resolvable:$true] %s68_s17 }
  0x37   :  { %s1894_s20 = scalar_lea.hbm %s2139_s2, 2048 }
  0x38   :  { %p1895_p10 = scmp.ne.s32.totalorder %s2139_s2, %s1894_s20  ;;  %p1898_p11 = scmp.lt.u32.totalorder %s1894_s20, %s2139_s2 }
  0x3a   :  { %p1900_p12 = pnand %p1898_p11, %p1895_p10 }
  0x3c   :  { %1903 = shalt.err (!%p1900_p12)
}
  0x3d   :  { %s1904_s0 = scalar_lea.vmem %s45_s15, 2048  ;;  %p1909_p0 = scmp.lt.s32.totalorder %s45_s15, %s45_s15 }
  0x3e   :  { %p1905_p13 = scmp.ne.s32.totalorder %s45_s15, %s1904_s0  ;;  %p1910_p1 = scmp.lt.s32.totalorder %s1904_s0, %s1904_s0 }
  0x40   :  { %p1911_p2 = por %p1910_p1, %p1909_p0 }
  0x42   :  { %p1912_p3 = pnand %p1911_p2, %p1905_p13 }
  0x44   :  { %1915 = shalt.err (!%p1912_p3)
}
  0x45   :  { %50 = dma.hbm_to_vmem [thread:$0]  %s2139_s2, 2048, %s45_s15, [#allocation6], %s1969_s7, %s1969_s7, %s1970_s8  }
  0x46   :  { %s1916_s27 = scalar_lea.hbm %s2141_s4, 1024 }
  0x47   :  { %p1917_p4 = scmp.ne.s32.totalorder %s2141_s4, %s1916_s27  ;;  %p1920_p5 = scmp.lt.u32.totalorder %s1916_s27, %s2141_s4 }
  0x49   :  { %p1922_p6 = pnand %p1920_p5, %p1917_p4 }
  0x4b   :  { %1925 = shalt.err (!%p1922_p6)
}
  0x4c   :  { %s1926_s3 = scalar_lea.vmem %s69_s17, 1024  ;;  %p1931_p8 = scmp.lt.s32.totalorder %s69_s17, %s69_s17 }
  0x4d   :  { %p1927_p7 = scmp.ne.s32.totalorder %s69_s17, %s1926_s3  ;;  %p1932_p9 = scmp.lt.s32.totalorder %s1926_s3, %s1926_s3 }
  0x4f   :  { %p1933_p10 = por %p1932_p9, %p1931_p8 }
  0x51   :  { %p1934_p11 = pnand %p1933_p10, %p1927_p7 }
  0x53   :  { %1937 = shalt.err (!%p1934_p11)
}
  0x54   :  { %74 = dma.hbm_to_vmem [thread:$0]  %s2141_s4, 1024, %s69_s17, [#allocation9], %s1969_s7, %s1969_s7, %s1970_s8  }
  0x55   :  { %1960 = dma.done.wait [#allocation3], 2048  }
  0x56   :  { %1961 = vsyncadd [#allocation3], 4294965248 }
  0x57   :  { %1962 = dma.done.wait [#allocation6], 4096  }
  0x58   :  { %1963 = vsyncadd [#allocation6], 4294963200 }
  0x59   :  { %1964 = dma.done.wait [#allocation9], 2048  }
  0x5a   :  { %1965 = vsyncadd [#allocation9], 4294965248  ;;  %v1780_v0 = vld [vmem:[#allocation5 + $0x40] sm:$0xff]   ;;  %v1782_v2 = vld [vmem:[#allocation5 + $0x48] sm:$0xff]  }
  0x5b   :  { %v1781_v1 = vld [vmem:[#allocation5] sm:$0xff]   ;;  %1482 = vmatprep.subr.bf16.mxu0 %v1780_v0  ;;  %v1783_v3 = vld [vmem:[#allocation5 + $0x8] sm:$0xff]   ;;  %v1784_v4 = vld [vmem:[#allocation5 + $0x50] sm:$0xff]  }
  0x5c   :  { %1483 = vmatpush3.bf16.msra.mxu0 %v1781_v1  ;;  %v1785_v5 = vld [vmem:[#allocation5 + $0x10] sm:$0xff]   ;;  %v1786_v6 = vld [vmem:[#allocation5 + $0x58] sm:$0xff]   ;;  %v1788_v8 = vld [vmem:[#allocation5 + $0x60] sm:$0xff]  }
  0x5d   :  { %1484 = vmatprep.subr.bf16.mxu0 %v1782_v2  ;;  %v1787_v7 = vld [vmem:[#allocation5 + $0x18] sm:$0xff]   ;;  %v1789_v9 = vld [vmem:[#allocation5 + $0x20] sm:$0xff]   ;;  %v1790_v10 = vld [vmem:[#allocation5 + $0x68] sm:$0xff]  }
  0x5e   :  { %v94_v11 = vld [vmem:[#allocation2 + $0x8] sm:$0xff]  ;;  %v1792_v14 = vld [vmem:[#allocation5 + $0x70] sm:$0xff]   ;;  %v1794_v16 = vld [vmem:[#allocation5 + $0x78] sm:$0xff]  }
  0x5f   :  { %v110_v12 = vunpack.c.l.s8.bf16 %v94_v11  ;;  %v1791_v13 = vld [vmem:[#allocation5 + $0x28] sm:$0xff]   ;;  %v1793_v15 = vld [vmem:[#allocation5 + $0x30] sm:$0xff]   ;;  %v1796_v17 = vld [vmem:[#allocation10] sm:$0xff]   ;;  %v112_v24 = vunpack.c.h.s8.bf16 %v94_v11 }
  0x60   :  { %1485 = vmatpush3.bf16.msra.mxu0 %v1783_v3  ;;  %v1797_v18 = vld [vmem:[#allocation10 + $0x8] sm:$0xff]   ;;  %v1795_v19 = vld [vmem:[#allocation5 + $0x38] sm:$0xff]   ;;  %v93_v20 = vld [vmem:[#allocation2] sm:$0xff]  ;;  %1642 = vmatprep.subr.bf16.mxu1 %v1796_v17 }
  0x61   :  { %1486 = vmatprep.subr.bf16.mxu0 %v1784_v4  ;;  %301 = vmatprep.mubr.bf16.mxu0 %v110_v12  ;;  %v1798_v21 = vld [vmem:[#allocation10 + $0x10] sm:$0xff]   ;;  %v109_v22 = vunpack.c.l.s8.bf16 %v93_v20  ;;  %v1804_v23 = vld [vmem:[#allocation7] sm:$0xff]   ;;  %v1799_v25 = vld [vmem:[#allocation10 + $0x18] sm:$0xff]   ;;  %v111_v27 = vunpack.c.h.s8.bf16 %v93_v20 }
  0x62   :  { %1643 = vmatpush3.bf16.msra.mxu1 %v1796_v17  ;;  %1658 = vmatprep.mubr.bf16.mxu1 %v1804_v23  ;;  %v96_v26 = vld [vmem:[#allocation2 + $0x18] sm:$0xff]  ;;  %v1800_v28 = vld [vmem:[#allocation10 + $0x20] sm:$0xff]   ;;  %v1801_v30 = vld [vmem:[#allocation10 + $0x28] sm:$0xff]  }
  0x63   :  { %1644 = vmatprep.subr.bf16.mxu1 %v1797_v18  ;;  %v114_v29 = vunpack.c.l.s8.bf16 %v96_v26  ;;  %v95_v31 = vld [vmem:[#allocation2 + $0x10] sm:$0xff]  ;;  %v116_v34 = vunpack.c.h.s8.bf16 %v96_v26  ;;  %v1803_v35 = vld [vmem:[#allocation10 + $0x38] sm:$0xff]   ;;  %v98_v36 = vld [vmem:[#allocation2 + $0x28] sm:$0xff] }
  0x64   :  { %1487 = vmatpush3.bf16.msra.mxu0 %v1785_v5  ;;  %v113_v32 = vunpack.c.l.s8.bf16 %v95_v31  ;;  %v1802_v33 = vld [vmem:[#allocation10 + $0x30] sm:$0xff]   ;;  %v115_v37 = vunpack.c.h.s8.bf16 %v95_v31  ;;  %v1814_v38 = vld [vmem:[#allocation8] sm:$0xff]   ;;  %v118_v39 = vunpack.c.l.s8.bf16 %v98_v36  ;;  %v1805_v40 = vld [vmem:[#allocation7 + $0x8] sm:$0xff]   ;;  %v120_v46 = vunpack.c.h.s8.bf16 %v98_v36 }
  0x65   :  { %1488 = vmatprep.subr.bf16.mxu0 %v1786_v6  ;;  %v1806_v41 = vld [vmem:[#allocation7 + $0x10] sm:$0xff]   ;;  %v1815_v42 = vld [vmem:[#allocation8 + $0x8] sm:$0xff]   ;;  %v97_v43 = vld [vmem:[#allocation2 + $0x20] sm:$0xff] }
  0x66   :  { %1645 = vmatpush3.bf16.msra.mxu1 %v1797_v18  ;;  %v117_v44 = vunpack.c.l.s8.bf16 %v97_v43  ;;  %v1818_v45 = vld [vmem:[#allocation8 + $0x10] sm:$0xff]   ;;  %v1807_v47 = vld [vmem:[#allocation7 + $0x18] sm:$0xff]   ;;  %v1808_v48 = vld [vmem:[#allocation7 + $0x20] sm:$0xff]   ;;  %v119_v51 = vunpack.c.h.s8.bf16 %v97_v43 }
  0x67   :  { %1646 = vmatprep.subr.bf16.mxu1 %v1798_v21  ;;  %v1819_v49 = vld [vmem:[#allocation8 + $0x18] sm:$0xff]   ;;  %v1809_v53 = vld [vmem:[#allocation7 + $0x28] sm:$0xff]   ;;  %v1810_v54 = vld [vmem:[#allocation7 + $0x30] sm:$0xff]  }
  0x68   :  { %1489 = vmatpush3.bf16.msra.mxu0 %v1787_v7  ;;  %v100_v50 = vld [vmem:[#allocation2 + $0x38] sm:$0xff]  ;;  %v99_v55 = vld [vmem:[#allocation2 + $0x30] sm:$0xff]  ;;  %v1812_v59 = vld [vmem:[#allocation7 + $0x40] sm:$0xff]  }
  0x69   :  { %1490 = vmatprep.subr.bf16.mxu0 %v1788_v8  ;;  %v122_v52 = vunpack.c.l.s8.bf16 %v100_v50  ;;  %v121_v56 = vunpack.c.l.s8.bf16 %v99_v55  ;;  %v124_v57 = vunpack.c.h.s8.bf16 %v100_v50  ;;  %v1811_v58 = vld [vmem:[#allocation7 + $0x38] sm:$0xff]   ;;  %v102_v60 = vld [vmem:[#allocation2 + $0x48] sm:$0xff]  ;;  %v123_v61 = vunpack.c.h.s8.bf16 %v99_v55  ;;  %v1816_v0 = vld [vmem:[#allocation7 + $0x50] sm:$0xff]  }
  0x6a   :  { %1647 = vmatpush3.bf16.msra.mxu1 %v1798_v21  ;;  %v126_v62 = vunpack.c.l.s8.bf16 %v102_v60  ;;  %v1813_v63 = vld [vmem:[#allocation7 + $0x48] sm:$0xff]   ;;  %v101_v1 = vld [vmem:[#allocation2 + $0x40] sm:$0xff]  ;;  %v128_v3 = vunpack.c.h.s8.bf16 %v102_v60  ;;  %v1817_v4 = vld [vmem:[#allocation7 + $0x58] sm:$0xff]  }
  0x6b   :  { %1648 = vmatprep.subr.bf16.mxu1 %v1799_v25  ;;  %v125_v2 = vunpack.c.l.s8.bf16 %v101_v1  ;;  %v1820_v5 = vld [vmem:[#allocation7 + $0x60] sm:$0xff]   ;;  %v104_v6 = vld [vmem:[#allocation2 + $0x58] sm:$0xff]  ;;  %v127_v7 = vunpack.c.h.s8.bf16 %v101_v1  ;;  %v1823_v17 = vld [vmem:[#allocation8 + $0x28] sm:$0xff]  }
  0x6c   :  { %1491 = vmatpush3.bf16.msra.mxu0 %v1789_v9  ;;  %v130_v8 = vunpack.c.l.s8.bf16 %v104_v6  ;;  %v1821_v9 = vld [vmem:[#allocation7 + $0x68] sm:$0xff]   ;;  %v132_v12 = vunpack.c.h.s8.bf16 %v104_v6  ;;  %v1824_v18 = vld [vmem:[#allocation7 + $0x70] sm:$0xff]   ;;  %v105_v20 = vld [vmem:[#allocation2 + $0x60] sm:$0xff] }
  0x6d   :  { %1492 = vmatprep.subr.bf16.mxu0 %v1790_v10  ;;  %v103_v10 = vld [vmem:[#allocation2 + $0x50] sm:$0xff]  ;;  %v135_v26 = vunpack.c.h.s8.bf16 %v105_v20 }
  0x6e   :  { %1649 = vmatpush3.bf16.msra.mxu1 %v1799_v25  ;;  %v129_v11 = vunpack.c.l.s8.bf16 %v103_v10  ;;  %v1826_v21 = vld [vmem:[#allocation8 + $0x30] sm:$0xff]   ;;  %v108_v25 = vld [vmem:[#allocation2 + $0x78] sm:$0xff] }
  0x6f   :  { %1650 = vmatprep.subr.bf16.mxu1 %v1800_v28 }
  0x70   :  { %1493 = vmatpush3.bf16.msra.mxu0 %v1791_v13  ;;  %v1822_v13 = vld [vmem:[#allocation8 + $0x20] sm:$0xff]  }
  0x71   :  { %1494 = vmatprep.subr.bf16.mxu0 %v1792_v14  ;;  %v106_v14 = vld [vmem:[#allocation2 + $0x68] sm:$0xff] }
  0x72   :  { %1651 = vmatpush3.bf16.msra.mxu1 %v1800_v28  ;;  %v136_v23 = vunpack.c.h.s8.bf16 %v106_v14  ;;  %v107_v28 = vld [vmem:[#allocation2 + $0x70] sm:$0xff] }
  0x73   :  { %1652 = vmatprep.subr.bf16.mxu1 %v1801_v30  ;;  %v139_v31 = vunpack.c.h.s8.bf16 %v107_v28 }
  0x74   :  { %1495 = vmatpush3.bf16.msra.mxu0 %v1793_v15  ;;  %v131_v15 = vunpack.c.h.s8.bf16 %v103_v10 }
  0x75   :  { %1496 = vmatprep.subr.bf16.mxu0 %v1794_v16  ;;  %v134_v16 = vunpack.c.l.s8.bf16 %v106_v14 }
  0x76   :  { %1653 = vmatpush3.bf16.msra.mxu1 %v1801_v30  ;;  %v140_v30 = vunpack.c.h.s8.bf16 %v108_v25 }
  0x77   :  { %1654 = vmatprep.subr.bf16.mxu1 %v1802_v33 }
  0x78   :  { %1497 = vmatpush3.bf16.msra.mxu0 %v1795_v19  ;;  %v1825_v19 = vld [vmem:[#allocation7 + $0x78] sm:$0xff]  }
  0x7a   :  { %1655 = vmatpush3.bf16.msra.mxu1 %v1802_v33 }
  0x7b   :  { %302 = vmatmul.mubr.bf16.vlgmr.msra.gmra.mrb[0].mxu0 %v109_v22  ;;  %1656 = vmatprep.subr.bf16.mxu1 %v1803_v35  ;;  %v133_v22 = vunpack.c.l.s8.bf16 %v105_v20 }
  0x7c   :  { %309 = vmatprep.mubr.bf16.mxu0 %v112_v24  ;;  %v1827_v24 = vld [vmem:[#allocation8 + $0x38] sm:$0xff]  }
  0x7e   :  { %1657 = vmatpush3.bf16.msra.mxu1 %v1803_v35 }
  0x7f   :  { %1690 = vmatprep.subr.bf16.mxu1 %v1814_v38 }
  0x81   :  { %1659 = vmatmul.mubr.bf16.vlgmr.msra.gmra.mrb[0].mxu1 %v1805_v40 }
  0x82   :  { %1662 = vmatprep.mubr.bf16.mxu1 %v1806_v41  ;;  %1691 = vmatpush3.bf16.msra.mxu1 %v1814_v38 }
  0x83   :  { %310 = vmatmul.mubr.bf16.gmra.mrb[4].mxu0 %v111_v27  ;;  %1692 = vmatprep.subr.bf16.mxu1 %v1815_v42  ;;  %v138_v27 = vunpack.c.l.s8.bf16 %v108_v25 }
  0x84   :  { %317 = vmatprep.mubr.bf16.mxu0 %v114_v29  ;;  %v137_v29 = vunpack.c.l.s8.bf16 %v107_v28 }
  0x86   :  { %1693 = vmatpush3.bf16.msra.mxu1 %v1815_v42 }
  0x87   :  { %1694 = vmatprep.subr.bf16.mxu1 %v1818_v45 }
  0x89   :  { %1663 = vmatmul.mubr.bf16.gmra.mrb[4].mxu1 %v1807_v47 }
  0x8a   :  { %1666 = vmatprep.mubr.bf16.mxu1 %v1808_v48  ;;  %1695 = vmatpush3.bf16.msra.mxu1 %v1818_v45 }
  0x8b   :  { %318 = vmatmul.mubr.bf16.gmra.mrb[8].mxu0 %v113_v32  ;;  %1696 = vmatprep.subr.bf16.mxu1 %v1819_v49 }
  0x8c   :  { %325 = vmatprep.mubr.bf16.mxu0 %v116_v34 }
  0x8e   :  { %1697 = vmatpush3.bf16.msra.mxu1 %v1819_v49 }
  0x8f   :  { %1698 = vmatprep.subr.bf16.mxu1 %v1822_v13 }
  0x91   :  { %1667 = vmatmul.mubr.bf16.gmra.mrb[8].mxu1 %v1809_v53 }
  0x92   :  { %1670 = vmatprep.mubr.bf16.mxu1 %v1810_v54  ;;  %1699 = vmatpush3.bf16.msra.mxu1 %v1822_v13 }
  0x93   :  { %326 = vmatmul.mubr.bf16.gmra.mrb[12].mxu0 %v115_v37  ;;  %1700 = vmatprep.subr.bf16.mxu1 %v1823_v17 }
  0x94   :  { %333 = vmatprep.mubr.bf16.mxu0 %v118_v39 }
  0x96   :  { %1701 = vmatpush3.bf16.msra.mxu1 %v1823_v17 }
  0x97   :  { %1702 = vmatprep.subr.bf16.mxu1 %v1826_v21 }
  0x99   :  { %1671 = vmatmul.mubr.bf16.gmra.mrb[12].mxu1 %v1811_v58 }
  0x9a   :  { %1674 = vmatprep.mubr.bf16.mxu1 %v1812_v59  ;;  %1703 = vmatpush3.bf16.msra.mxu1 %v1826_v21 }
  0x9b   :  { %334 = vmatmul.mubr.bf16.gmra.mrb[16].mxu0 %v117_v44  ;;  %1704 = vmatprep.subr.bf16.mxu1 %v1827_v24 }
  0x9c   :  { %341 = vmatprep.mubr.bf16.mxu0 %v120_v46 }
  0x9e   :  { %1705 = vmatpush3.bf16.msra.mxu1 %v1827_v24 }
  0xa1   :  { %1675 = vmatmul.mubr.bf16.gmra.mrb[16].mxu1 %v1813_v63 }
  0xa2   :  { %1678 = vmatprep.mubr.bf16.mxu1 %v1816_v0 }
  0xa3   :  { %342 = vmatmul.mubr.bf16.gmra.mrb[20].mxu0 %v119_v51 }
  0xa4   :  { %349 = vmatprep.mubr.bf16.mxu0 %v122_v52 }
  0xa9   :  { %1679 = vmatmul.mubr.bf16.gmra.mrb[20].mxu1 %v1817_v4 }
  0xaa   :  { %1682 = vmatprep.mubr.bf16.mxu1 %v1820_v5 }
  0xab   :  { %350 = vmatmul.mubr.bf16.gmra.mrb[24].mxu0 %v121_v56 }
  0xac   :  { %357 = vmatprep.mubr.bf16.mxu0 %v124_v57 }
  0xb1   :  { %1683 = vmatmul.mubr.bf16.gmra.mrb[24].mxu1 %v1821_v9 }
  0xb2   :  { %1686 = vmatprep.mubr.bf16.mxu1 %v1824_v18 }
  0xb3   :  { %358 = vmatmul.mubr.bf16.gmra.mrb[28].mxu0 %v123_v61 }
  0xb4   :  { %365 = vmatprep.mubr.bf16.mxu0 %v126_v62 }
  0xb9   :  { %1687 = vmatmul.mubr.bf16.gmra.mrb[28].mxu1 %v1825_v19 }
  0xbb   :  { %366 = vmatmul.mubr.bf16.gmra.mrb[32].mxu0 %v125_v2 }
  0xbc   :  { %373 = vmatprep.mubr.bf16.mxu0 %v128_v3 }
  0xc3   :  { %374 = vmatmul.mubr.bf16.gmra.mrb[36].mxu0 %v127_v7 }
  0xc4   :  { %381 = vmatprep.mubr.bf16.mxu0 %v130_v8 }
  0xcb   :  { %382 = vmatmul.mubr.bf16.gmra.mrb[40].mxu0 %v129_v11 }
  0xcc   :  { %389 = vmatprep.mubr.bf16.mxu0 %v132_v12 }
  0xd3   :  { %390 = vmatmul.mubr.bf16.gmra.mrb[44].mxu0 %v131_v15 }
  0xd4   :  { %397 = vmatprep.mubr.bf16.mxu0 %v134_v16 }
  0xdb   :  { %398 = vmatmul.mubr.bf16.gmra.mrb[48].mxu0 %v133_v22 }
  0xdc   :  { %405 = vmatprep.mubr.bf16.mxu0 %v136_v23 }
  0xe3   :  { %406 = vmatmul.mubr.bf16.gmra.mrb[52].mxu0 %v135_v26 }
  0xe4   :  { %413 = vmatprep.mubr.bf16.mxu0 %v138_v27 }
  0xeb   :  { %414 = vmatmul.mubr.bf16.gmra.mrb[56].mxu0 %v137_v29 }
  0xec   :  { %421 = vmatprep.mubr.bf16.mxu0 %v140_v30 }
  0xf3   :  { %422 = vmatmul.mubr.bf16.gmra.mrb[60].mxu0 %v139_v31 }
 0x14e   :  { %v1498_v32 = vpop.f32.mrb[0].mxu0 }
 0x14f   :  { %v1499_v33 = vpop.f32.mrb[1].mxu0 }
 0x150   :  { %v1500_v34 = vadd.f32 %v1499_v33, %v1498_v32  ;;  %v1501_v35 = vpop.f32.mrb[2].mxu0 }
 0x151   :  { %v1502_v36 = vpop.f32.mrb[3].mxu0 }
 0x152   :  { %v1503_v37 = vadd.f32 %v1502_v36, %v1501_v35 }
 0x154   :  { %v430_v38 = vpack.c.bf16 %v1503_v37, %v1500_v34 }
 0x156   :  { %v1504_v39 = vpop.f32.mrb[4].mxu0  ;;  %1706 = vmatprep.mubr.bf16.mxu1 %v430_v38 }
 0x157   :  { %v1505_v40 = vpop.f32.mrb[5].mxu0 }
 0x158   :  { %v1506_v41 = vadd.f32 %v1505_v40, %v1504_v39  ;;  %v1507_v42 = vpop.f32.mrb[6].mxu0 }
 0x159   :  { %v1508_v43 = vpop.f32.mrb[7].mxu0 }
 0x15a   :  { %v1509_v44 = vadd.f32 %v1508_v43, %v1507_v42 }
 0x15c   :  { %v431_v45 = vpack.c.bf16 %v1509_v44, %v1506_v41 }
 0x15e   :  { %v1510_v46 = vpop.f32.mrb[8].mxu0  ;;  %1707 = vmatmul.mubr.bf16.vlgmr.msra.gmra.mrb[0].mxu1 %v431_v45 }
 0x15f   :  { %v1511_v47 = vpop.f32.mrb[9].mxu0 }
 0x160   :  { %v1512_v48 = vadd.f32 %v1511_v47, %v1510_v46  ;;  %v1513_v49 = vpop.f32.mrb[10].mxu0 }
 0x161   :  { %v1514_v50 = vpop.f32.mrb[11].mxu0 }
 0x162   :  { %v1515_v51 = vadd.f32 %v1514_v50, %v1513_v49 }
 0x164   :  { %v432_v52 = vpack.c.bf16 %v1515_v51, %v1512_v48 }
 0x166   :  { %v1516_v53 = vpop.f32.mrb[12].mxu0  ;;  %1710 = vmatprep.mubr.bf16.mxu1 %v432_v52 }
 0x167   :  { %v1517_v54 = vpop.f32.mrb[13].mxu0 }
 0x168   :  { %v1518_v55 = vadd.f32 %v1517_v54, %v1516_v53  ;;  %v1519_v56 = vpop.f32.mrb[14].mxu0 }
 0x169   :  { %v1520_v57 = vpop.f32.mrb[15].mxu0 }
 0x16a   :  { %v1521_v58 = vadd.f32 %v1520_v57, %v1519_v56 }
 0x16c   :  { %v433_v59 = vpack.c.bf16 %v1521_v58, %v1518_v55 }
 0x16e   :  { %v1522_v60 = vpop.f32.mrb[16].mxu0  ;;  %1711 = vmatmul.mubr.bf16.gmra.mrb[4].mxu1 %v433_v59 }
 0x16f   :  { %v1523_v61 = vpop.f32.mrb[17].mxu0 }
 0x170   :  { %v1524_v62 = vadd.f32 %v1523_v61, %v1522_v60  ;;  %v1525_v63 = vpop.f32.mrb[18].mxu0 }
 0x171   :  { %v1526_v0 = vpop.f32.mrb[19].mxu0 }
 0x172   :  { %v1527_v1 = vadd.f32 %v1526_v0, %v1525_v63 }
 0x174   :  { %v434_v2 = vpack.c.bf16 %v1527_v1, %v1524_v62 }
 0x176   :  { %v1528_v3 = vpop.f32.mrb[20].mxu0  ;;  %1714 = vmatprep.mubr.bf16.mxu1 %v434_v2 }
 0x177   :  { %v1529_v4 = vpop.f32.mrb[21].mxu0 }
 0x178   :  { %v1530_v5 = vadd.f32 %v1529_v4, %v1528_v3  ;;  %v1531_v6 = vpop.f32.mrb[22].mxu0 }
 0x179   :  { %v1532_v7 = vpop.f32.mrb[23].mxu0 }
 0x17a   :  { %v1533_v8 = vadd.f32 %v1532_v7, %v1531_v6 }
 0x17c   :  { %v435_v9 = vpack.c.bf16 %v1533_v8, %v1530_v5 }
 0x17e   :  { %v1534_v10 = vpop.f32.mrb[24].mxu0  ;;  %1715 = vmatmul.mubr.bf16.gmra.mrb[8].mxu1 %v435_v9 }
 0x17f   :  { %v1535_v11 = vpop.f32.mrb[25].mxu0 }
 0x180   :  { %v1536_v12 = vadd.f32 %v1535_v11, %v1534_v10  ;;  %v1537_v13 = vpop.f32.mrb[26].mxu0 }
 0x181   :  { %v1538_v14 = vpop.f32.mrb[27].mxu0 }
 0x182   :  { %v1539_v15 = vadd.f32 %v1538_v14, %v1537_v13 }
 0x184   :  { %v436_v16 = vpack.c.bf16 %v1539_v15, %v1536_v12 }
 0x186   :  { %v1540_v17 = vpop.f32.mrb[28].mxu0  ;;  %1718 = vmatprep.mubr.bf16.mxu1 %v436_v16  ;;  %v2088_v16 = vld [vmem:[%s2142_s5] ss:$0 sm:$0xff]  ;;  %s1977_s5 = smov [#allocation11]  }
 0x187   :  { %v1541_v18 = vpop.f32.mrb[29].mxu0  ;;  %s1260_s12 = sshll.u32 %s1977_s5, 4  ;;  %s1261_s12 = int_to_ptr.vmem [resolvable:$true] %s1260_s12 }
 0x188   :  { %v1542_v19 = vadd.f32 %v1541_v18, %v1540_v17  ;;  %v1543_v20 = vpop.f32.mrb[30].mxu0  ;;  %s1938_s13 = scalar_lea.vmem %s1261_s12, 2048  ;;  %p1943_p13 = scmp.lt.s32.totalorder %s1261_s12, %s1261_s12 }
 0x189   :  { %v1544_v21 = vpop.f32.mrb[31].mxu0  ;;  %p1939_p12 = scmp.ne.s32.totalorder %s1261_s12, %s1938_s13  ;;  %p1944_p0 = scmp.lt.s32.totalorder %s1938_s13, %s1938_s13 }
 0x18a   :  { %v1545_v22 = vadd.f32 %v1544_v21, %v1543_v20 }
 0x18b   :  { %p1945_p1 = por %p1944_p0, %p1943_p13 }
 0x18c   :  { %v437_v23 = vpack.c.bf16 %v1545_v22, %v1542_v19 }
 0x18d   :  { %p1946_p2 = pnand %p1945_p1, %p1939_p12 }
 0x18e   :  { %v1546_v24 = vpop.f32.mrb[32].mxu0  ;;  %1719 = vmatmul.mubr.bf16.gmra.mrb[12].mxu1 %v437_v23 }
 0x18f   :  { %v1547_v25 = vpop.f32.mrb[33].mxu0 }
 0x190   :  { %v1548_v26 = vadd.f32 %v1547_v25, %v1546_v24  ;;  %v1549_v27 = vpop.f32.mrb[34].mxu0 }
 0x191   :  { %v1550_v28 = vpop.f32.mrb[35].mxu0 }
 0x192   :  { %v1551_v29 = vadd.f32 %v1550_v28, %v1549_v27 }
 0x194   :  { %v438_v30 = vpack.c.bf16 %v1551_v29, %v1548_v26 }
 0x196   :  { %v1552_v31 = vpop.f32.mrb[36].mxu0  ;;  %1722 = vmatprep.mubr.bf16.mxu1 %v438_v30 }
 0x197   :  { %v1553_v32 = vpop.f32.mrb[37].mxu0 }
 0x198   :  { %v1554_v33 = vadd.f32 %v1553_v32, %v1552_v31  ;;  %v1555_v34 = vpop.f32.mrb[38].mxu0 }
 0x199   :  { %v1556_v35 = vpop.f32.mrb[39].mxu0 }
 0x19a   :  { %v1557_v36 = vadd.f32 %v1556_v35, %v1555_v34 }
 0x19c   :  { %v439_v37 = vpack.c.bf16 %v1557_v36, %v1554_v33 }
 0x19e   :  { %v1558_v38 = vpop.f32.mrb[40].mxu0  ;;  %1723 = vmatmul.mubr.bf16.gmra.mrb[16].mxu1 %v439_v37 }
 0x19f   :  { %v1559_v39 = vpop.f32.mrb[41].mxu0 }
 0x1a0   :  { %v1560_v40 = vadd.f32 %v1559_v39, %v1558_v38  ;;  %v1561_v41 = vpop.f32.mrb[42].mxu0 }
 0x1a1   :  { %v1562_v42 = vpop.f32.mrb[43].mxu0 }
 0x1a2   :  { %v1563_v43 = vadd.f32 %v1562_v42, %v1561_v41 }
 0x1a4   :  { %v440_v44 = vpack.c.bf16 %v1563_v43, %v1560_v40 }
 0x1a6   :  { %v1564_v45 = vpop.f32.mrb[44].mxu0  ;;  %1726 = vmatprep.mubr.bf16.mxu1 %v440_v44 }
 0x1a7   :  { %v1565_v46 = vpop.f32.mrb[45].mxu0 }
 0x1a8   :  { %v1566_v47 = vadd.f32 %v1565_v46, %v1564_v45  ;;  %v1567_v48 = vpop.f32.mrb[46].mxu0 }
 0x1a9   :  { %v1568_v49 = vpop.f32.mrb[47].mxu0 }
 0x1aa   :  { %v1569_v50 = vadd.f32 %v1568_v49, %v1567_v48 }
 0x1ac   :  { %v441_v51 = vpack.c.bf16 %v1569_v50, %v1566_v47 }
 0x1ae   :  { %v1570_v52 = vpop.f32.mrb[48].mxu0  ;;  %1727 = vmatmul.mubr.bf16.gmra.mrb[20].mxu1 %v441_v51 }
 0x1af   :  { %v1571_v53 = vpop.f32.mrb[49].mxu0 }
 0x1b0   :  { %v1572_v54 = vadd.f32 %v1571_v53, %v1570_v52  ;;  %v1573_v55 = vpop.f32.mrb[50].mxu0 }
 0x1b1   :  { %v1574_v56 = vpop.f32.mrb[51].mxu0 }
 0x1b2   :  { %v1575_v57 = vadd.f32 %v1574_v56, %v1573_v55 }
 0x1b4   :  { %v442_v58 = vpack.c.bf16 %v1575_v57, %v1572_v54 }
 0x1b6   :  { %v1576_v59 = vpop.f32.mrb[52].mxu0  ;;  %1730 = vmatprep.mubr.bf16.mxu1 %v442_v58 }
 0x1b7   :  { %v1577_v60 = vpop.f32.mrb[53].mxu0 }
 0x1b8   :  { %v1578_v61 = vadd.f32 %v1577_v60, %v1576_v59  ;;  %v1579_v62 = vpop.f32.mrb[54].mxu0 }
 0x1b9   :  { %v1580_v63 = vpop.f32.mrb[55].mxu0 }
 0x1ba   :  { %v1581_v0 = vadd.f32 %v1580_v63, %v1579_v62 }
 0x1bc   :  { %v443_v1 = vpack.c.bf16 %v1581_v0, %v1578_v61 }
 0x1be   :  { %v1582_v2 = vpop.f32.mrb[56].mxu0  ;;  %1731 = vmatmul.mubr.bf16.gmra.mrb[24].mxu1 %v443_v1 }
 0x1bf   :  { %v1583_v3 = vpop.f32.mrb[57].mxu0 }
 0x1c0   :  { %v1584_v4 = vadd.f32 %v1583_v3, %v1582_v2  ;;  %v1585_v5 = vpop.f32.mrb[58].mxu0 }
 0x1c1   :  { %v1586_v6 = vpop.f32.mrb[59].mxu0 }
 0x1c2   :  { %v1587_v7 = vadd.f32 %v1586_v6, %v1585_v5 }
 0x1c4   :  { %v444_v8 = vpack.c.bf16 %v1587_v7, %v1584_v4 }
 0x1c6   :  { %v1588_v9 = vpop.f32.mrb[60].mxu0  ;;  %1734 = vmatprep.mubr.bf16.mxu1 %v444_v8 }
 0x1c7   :  { %v1589_v10 = vpop.f32.mrb[61].mxu0 }
 0x1c8   :  { %v1590_v11 = vadd.f32 %v1589_v10, %v1588_v9  ;;  %v1591_v12 = vpop.f32.mrb[62].mxu0 }
 0x1c9   :  { %v1592_v13 = vpop.f32.mrb[63].mxu0 }
 0x1ca   :  { %v1593_v14 = vadd.f32 %v1592_v13, %v1591_v12 }
 0x1cc   :  { %v445_v15 = vpack.c.bf16 %v1593_v14, %v1590_v11 }
 0x1ce   :  { %1735 = vmatmul.mubr.bf16.gmra.mrb[28].mxu1 %v445_v15 }
 0x231   :  { %v1708_v17 = vpop.f32.mrb[0].mxu1 }
 0x232   :  { %v1033_v18 = vadd.f32 %v1708_v17, %v2088_v16  ;;  %v897_v19 = vpop.f32.mrb[1].mxu1 }
 0x233   :  { %v1031_v20 = vadd.f32 %v2088_v16, %v897_v19  ;;  %v1709_v21 = vpop.f32.mrb[2].mxu1 }
 0x234   :  { %v1034_v22 = vadd.f32 %v1709_v21, %v2088_v16  ;;  %v900_v23 = vpop.f32.mrb[3].mxu1  ;;  %v1065_v25 = vmax.f32 %v1033_v18, 0.0 }
 0x235   :  { %v1032_v24 = vadd.f32 %v2088_v16, %v900_v23  ;;  %v1063_v27 = vmax.f32 %v1031_v20, 0.0 }
 0x236   :  { %v1066_v26 = vmax.f32 %v1034_v22, 0.0 }
 0x237   :  { %v1064_v28 = vmax.f32 %v1032_v24, 0.0 }
 0x238   :  { %v1395_v29 = vpack.c.bf16 %v1066_v26, %v1065_v25 }
 0x239   :  { %v1390_v30 = vpack.c.bf16 %v1064_v28, %v1063_v27 }
 0x23a   :  { %1467 = vst [vmem:[#allocation11 + $0x8] sm:$0xff] %v1395_v29  }
 0x23b   :  { %1391 = vst [vmem:[#allocation11] sm:$0xff] %v1390_v30  }
 0x241   :  { %v1712_v31 = vpop.f32.mrb[4].mxu1 }
 0x242   :  { %v1037_v32 = vadd.f32 %v1712_v31, %v2088_v16  ;;  %v913_v33 = vpop.f32.mrb[5].mxu1 }
 0x243   :  { %v1035_v34 = vadd.f32 %v2088_v16, %v913_v33  ;;  %v1713_v35 = vpop.f32.mrb[6].mxu1 }
 0x244   :  { %v1038_v36 = vadd.f32 %v1713_v35, %v2088_v16  ;;  %v916_v37 = vpop.f32.mrb[7].mxu1  ;;  %v1069_v39 = vmax.f32 %v1037_v32, 0.0 }
 0x245   :  { %v1036_v38 = vadd.f32 %v2088_v16, %v916_v37  ;;  %v1067_v41 = vmax.f32 %v1035_v34, 0.0 }
 0x246   :  { %v1070_v40 = vmax.f32 %v1038_v36, 0.0 }
 0x247   :  { %v1068_v42 = vmax.f32 %v1036_v38, 0.0 }
 0x248   :  { %v1405_v43 = vpack.c.bf16 %v1070_v40, %v1069_v39 }
 0x249   :  { %v1400_v44 = vpack.c.bf16 %v1068_v42, %v1067_v41 }
 0x24a   :  { %1469 = vst [vmem:[#allocation11 + $0x18] sm:$0xff] %v1405_v43  }
 0x24b   :  { %1468 = vst [vmem:[#allocation11 + $0x10] sm:$0xff] %v1400_v44  }
 0x251   :  { %v1716_v45 = vpop.f32.mrb[8].mxu1 }
 0x252   :  { %v1041_v46 = vadd.f32 %v1716_v45, %v2088_v16  ;;  %v929_v47 = vpop.f32.mrb[9].mxu1 }
 0x253   :  { %v1039_v48 = vadd.f32 %v2088_v16, %v929_v47  ;;  %v1717_v49 = vpop.f32.mrb[10].mxu1 }
 0x254   :  { %v1042_v50 = vadd.f32 %v1717_v49, %v2088_v16  ;;  %v932_v51 = vpop.f32.mrb[11].mxu1  ;;  %v1073_v53 = vmax.f32 %v1041_v46, 0.0 }
 0x255   :  { %v1040_v52 = vadd.f32 %v2088_v16, %v932_v51  ;;  %v1071_v55 = vmax.f32 %v1039_v48, 0.0 }
 0x256   :  { %v1074_v54 = vmax.f32 %v1042_v50, 0.0 }
 0x257   :  { %v1072_v56 = vmax.f32 %v1040_v52, 0.0 }
 0x258   :  { %v1415_v57 = vpack.c.bf16 %v1074_v54, %v1073_v53 }
 0x259   :  { %v1410_v58 = vpack.c.bf16 %v1072_v56, %v1071_v55 }
 0x25a   :  { %1471 = vst [vmem:[#allocation11 + $0x28] sm:$0xff] %v1415_v57  }
 0x25b   :  { %1470 = vst [vmem:[#allocation11 + $0x20] sm:$0xff] %v1410_v58  }
 0x261   :  { %v1720_v59 = vpop.f32.mrb[12].mxu1 }
 0x262   :  { %v1045_v60 = vadd.f32 %v1720_v59, %v2088_v16  ;;  %v945_v61 = vpop.f32.mrb[13].mxu1 }
 0x263   :  { %v1043_v62 = vadd.f32 %v2088_v16, %v945_v61  ;;  %v1721_v63 = vpop.f32.mrb[14].mxu1 }
 0x264   :  { %v1046_v0 = vadd.f32 %v1721_v63, %v2088_v16  ;;  %v948_v1 = vpop.f32.mrb[15].mxu1  ;;  %v1077_v3 = vmax.f32 %v1045_v60, 0.0 }
 0x265   :  { %v1044_v2 = vadd.f32 %v2088_v16, %v948_v1  ;;  %v1075_v5 = vmax.f32 %v1043_v62, 0.0 }
 0x266   :  { %v1078_v4 = vmax.f32 %v1046_v0, 0.0 }
 0x267   :  { %v1076_v6 = vmax.f32 %v1044_v2, 0.0 }
 0x268   :  { %v1425_v7 = vpack.c.bf16 %v1078_v4, %v1077_v3 }
 0x269   :  { %v1420_v8 = vpack.c.bf16 %v1076_v6, %v1075_v5 }
 0x26a   :  { %1473 = vst [vmem:[#allocation11 + $0x38] sm:$0xff] %v1425_v7  }
 0x26b   :  { %1472 = vst [vmem:[#allocation11 + $0x30] sm:$0xff] %v1420_v8  }
 0x271   :  { %v1724_v9 = vpop.f32.mrb[16].mxu1 }
 0x272   :  { %v1049_v10 = vadd.f32 %v1724_v9, %v2088_v16  ;;  %v961_v11 = vpop.f32.mrb[17].mxu1 }
 0x273   :  { %v1047_v12 = vadd.f32 %v2088_v16, %v961_v11  ;;  %v1725_v13 = vpop.f32.mrb[18].mxu1 }
 0x274   :  { %v1050_v14 = vadd.f32 %v1725_v13, %v2088_v16  ;;  %v964_v15 = vpop.f32.mrb[19].mxu1  ;;  %v1081_v18 = vmax.f32 %v1049_v10, 0.0 }
 0x275   :  { %v1048_v17 = vadd.f32 %v2088_v16, %v964_v15  ;;  %v1079_v20 = vmax.f32 %v1047_v12, 0.0 }
 0x276   :  { %v1082_v19 = vmax.f32 %v1050_v14, 0.0 }
 0x277   :  { %v1080_v21 = vmax.f32 %v1048_v17, 0.0 }
 0x278   :  { %v1435_v22 = vpack.c.bf16 %v1082_v19, %v1081_v18 }
 0x279   :  { %v1430_v23 = vpack.c.bf16 %v1080_v21, %v1079_v20 }
 0x27a   :  { %1475 = vst [vmem:[#allocation11 + $0x48] sm:$0xff] %v1435_v22  }
 0x27b   :  { %1474 = vst [vmem:[#allocation11 + $0x40] sm:$0xff] %v1430_v23  }
 0x281   :  { %v1728_v24 = vpop.f32.mrb[20].mxu1 }
 0x282   :  { %v1053_v25 = vadd.f32 %v1728_v24, %v2088_v16  ;;  %v977_v26 = vpop.f32.mrb[21].mxu1 }
 0x283   :  { %v1051_v27 = vadd.f32 %v2088_v16, %v977_v26  ;;  %v1729_v28 = vpop.f32.mrb[22].mxu1 }
 0x284   :  { %v1054_v29 = vadd.f32 %v1729_v28, %v2088_v16  ;;  %v980_v30 = vpop.f32.mrb[23].mxu1  ;;  %v1085_v32 = vmax.f32 %v1053_v25, 0.0 }
 0x285   :  { %v1052_v31 = vadd.f32 %v2088_v16, %v980_v30  ;;  %v1083_v34 = vmax.f32 %v1051_v27, 0.0 }
 0x286   :  { %v1086_v33 = vmax.f32 %v1054_v29, 0.0 }
 0x287   :  { %v1084_v35 = vmax.f32 %v1052_v31, 0.0 }
 0x288   :  { %v1445_v36 = vpack.c.bf16 %v1086_v33, %v1085_v32 }
 0x289   :  { %v1440_v37 = vpack.c.bf16 %v1084_v35, %v1083_v34 }
 0x28a   :  { %1477 = vst [vmem:[#allocation11 + $0x58] sm:$0xff] %v1445_v36  }
 0x28b   :  { %1476 = vst [vmem:[#allocation11 + $0x50] sm:$0xff] %v1440_v37  }
 0x291   :  { %v1732_v38 = vpop.f32.mrb[24].mxu1 }
 0x292   :  { %v1057_v39 = vadd.f32 %v1732_v38, %v2088_v16  ;;  %v993_v40 = vpop.f32.mrb[25].mxu1 }
 0x293   :  { %v1055_v41 = vadd.f32 %v2088_v16, %v993_v40  ;;  %v1733_v42 = vpop.f32.mrb[26].mxu1 }
 0x294   :  { %v1058_v43 = vadd.f32 %v1733_v42, %v2088_v16  ;;  %v996_v44 = vpop.f32.mrb[27].mxu1  ;;  %v1089_v46 = vmax.f32 %v1057_v39, 0.0 }
 0x295   :  { %v1056_v45 = vadd.f32 %v2088_v16, %v996_v44  ;;  %v1087_v48 = vmax.f32 %v1055_v41, 0.0 }
 0x296   :  { %v1090_v47 = vmax.f32 %v1058_v43, 0.0 }
 0x297   :  { %v1088_v49 = vmax.f32 %v1056_v45, 0.0 }
 0x298   :  { %v1455_v50 = vpack.c.bf16 %v1090_v47, %v1089_v46 }
 0x299   :  { %v1450_v51 = vpack.c.bf16 %v1088_v49, %v1087_v48 }
 0x29a   :  { %1479 = vst [vmem:[#allocation11 + $0x68] sm:$0xff] %v1455_v50  }
 0x29b   :  { %1478 = vst [vmem:[#allocation11 + $0x60] sm:$0xff] %v1450_v51  }
 0x2a1   :  { %v1736_v52 = vpop.f32.mrb[28].mxu1 }
 0x2a2   :  { %v1061_v53 = vadd.f32 %v1736_v52, %v2088_v16  ;;  %v1009_v54 = vpop.f32.mrb[29].mxu1 }
 0x2a3   :  { %v1059_v55 = vadd.f32 %v2088_v16, %v1009_v54  ;;  %v1737_v56 = vpop.f32.mrb[30].mxu1 }
 0x2a4   :  { %v1062_v57 = vadd.f32 %v1737_v56, %v2088_v16  ;;  %v1012_v58 = vpop.f32.mrb[31].mxu1  ;;  %v1093_v60 = vmax.f32 %v1061_v53, 0.0 }
 0x2a5   :  { %v1060_v59 = vadd.f32 %v2088_v16, %v1012_v58  ;;  %v1091_v62 = vmax.f32 %v1059_v55, 0.0 }
 0x2a6   :  { %v1094_v61 = vmax.f32 %v1062_v57, 0.0 }
 0x2a7   :  { %v1092_v63 = vmax.f32 %v1060_v59, 0.0 }
 0x2a8   :  { %v1465_v0 = vpack.c.bf16 %v1094_v61, %v1093_v60 }
 0x2a9   :  { %v1460_v1 = vpack.c.bf16 %v1092_v63, %v1091_v62 }
 0x2aa   :  { %1481 = vst [vmem:[#allocation11 + $0x78] sm:$0xff] %v1465_v0  }
 0x2ab   :  { %1480 = vst [vmem:[#allocation11 + $0x70] sm:$0xff] %v1460_v1  }
 0x2ac   :  { %1949 = shalt.err (!%p1946_p2)
}
 0x2ad   :  { %s1950_s17 = scalar_lea.hbm %s2143_s6, 2048 }
 0x2ae   :  { %p1951_p3 = scmp.ne.s32.totalorder %s2143_s6, %s1950_s17  ;;  %p1954_p4 = scmp.lt.u32.totalorder %s1950_s17, %s2143_s6 }
 0x2b0   :  { %p1956_p5 = pnand %p1954_p4, %p1951_p3 }
 0x2b2   :  { %1959 = shalt.err (!%p1956_p5)
}
 0x2b3   :  { %1266 = dma.vmem_to_hbm [thread:$0]  %s1261_s12, 2048, %s2143_s6, [#allocation4], %s1969_s7, %s1969_s7, %s1970_s8  }
 0x2b4   :  { %1966 = dma.done.wait [#allocation4], 2048  }
 0x2b5   :  { %1967 = vsyncadd [#allocation4], 4294965248 }
 0x2b6   :  { %1270 = vsyncpa [#allocation3], 1 }
 0x2b7   :  { %1271 = vsyncpa [#allocation6], 1 }
 0x2b8   :  { %1272 = vsyncpa [#allocation9], 1 }
 0x2b9   :  { %1273 = vsyncpa [#allocation4], 1 }

</bundles_post_ra>
